<compile_context>
chip_gen: v5e
topology: v5e:2x2
jax: 0.10.0
libtpu: 0.0.40
codegen_flags: <defaults>
</compile_context>

<pallas_src>
import functools

import jax
import jax.numpy as jnp
from jax.experimental import pallas as pl
from jax.experimental.pallas import tpu as pltpu

_LANE = 128
_DEFAULT_TILE_BYTES = 4 * 1024 * 1024  # per input tile (double-buffered by Pallas)


def _max_identity(dtype):
    dtype = jnp.dtype(dtype)
    if jnp.issubdtype(dtype, jnp.floating):
        return float("-inf")
    if jnp.issubdtype(dtype, jnp.integer):
        return int(jnp.iinfo(dtype).min)
    raise TypeError(f"unsupported dtype for max reduction: {dtype}")


def _pick_tiles(B, C, N, itemsize, target_tile_bytes=_DEFAULT_TILE_BYTES):
    # Batch tile: full B if small, else 8 (keeps output block sublane-aligned).
    tb = B if B <= 8 else 8
    # Points tile: largest multiple of 128 that keeps the input tile under the
    # VMEM target, but no larger than N rounded up to a lane multiple.
    n_pad = pl.cdiv(N, _LANE) * _LANE
    per_lane_bytes = max(1, tb * C * itemsize)
    tn = max(_LANE, (target_tile_bytes // per_lane_bytes) // _LANE * _LANE)
    return int(tb), int(min(tn, n_pad))


def _make_kernel(tn, n_total, neg):
    rem = n_total % tn            # valid lanes in the last N block (0 => all full)
    full_chunks = tn // _LANE

    def _consume_unmasked(x_ref, acc_ref):
        # Running elementwise max over 128-lane chunks: pure VPU work.
        for k in range(full_chunks):
            chunk = x_ref[:, :, pl.ds(k * _LANE, _LANE)]
            acc_ref[...] = jnp.maximum(acc_ref[...], chunk)

    def _consume_masked(x_ref, acc_ref):
        # Last (partial) N block: only touch the `rem` valid lanes.
        n_full = rem // _LANE
        for k in range(n_full):
            chunk = x_ref[:, :, pl.ds(k * _LANE, _LANE)]
            acc_ref[...] = jnp.maximum(acc_ref[...], chunk)
        tail = rem % _LANE
        if tail:
            chunk = x_ref[:, :, pl.ds(n_full * _LANE, _LANE)]
            lane = jax.lax.broadcasted_iota(jnp.int32, chunk.shape, 2)
            chunk = jnp.where(lane < tail, chunk, jnp.asarray(neg, chunk.dtype))
            acc_ref[...] = jnp.maximum(acc_ref[...], chunk)

    def kernel(x_ref, o_ref, acc_ref):
        n_idx = pl.program_id(1)
        n_last = pl.num_programs(1) - 1

        @pl.when(n_idx == 0)
        def _():
            acc_ref[...] = jnp.full(acc_ref.shape, neg, acc_ref.dtype)

        if rem == 0:
            _consume_unmasked(x_ref, acc_ref)
        else:
            @pl.when(n_idx != n_last)
            def _():
                _consume_unmasked(x_ref, acc_ref)

            @pl.when(n_idx == n_last)
            def _():
                _consume_masked(x_ref, acc_ref)

        @pl.when(n_idx == n_last)
        def _():
            # One cross-lane (XLU) reduction per output block, at the very end.
            o_ref[...] = jnp.max(acc_ref[...], axis=-1).astype(o_ref.dtype)

    return kernel


def _global_max_pallas(x, tb, tn):
    B, C, N = x.shape
    itemsize = x.dtype.itemsize
    neg = _max_identity(x.dtype)

    kernel = _make_kernel(tn, N, neg)
    grid = (pl.cdiv(B, tb), pl.cdiv(N, tn))

    return pl.pallas_call(
        kernel,
        out_shape=jax.ShapeDtypeStruct((B, C), x.dtype),
        grid_spec=pltpu.PrefetchScalarGridSpec(
            num_scalar_prefetch=0,
            grid=grid,
            in_specs=[pl.BlockSpec((tb, C, tn), lambda b, n: (b, 0, n))],
            out_specs=pl.BlockSpec((tb, C), lambda b, n: (b, 0)),
            scratch_shapes=[pltpu.VMEM((tb, C, _LANE), x.dtype)],
        ),
        compiler_params=pltpu.CompilerParams(
            dimension_semantics=("parallel", "arbitrary"),
            vmem_limit_bytes=32 * 1024 * 1024,
        ),
        cost_estimate=pl.CostEstimate(
            flops=B * C * N,                       # one compare per element
            transcendentals=0,
            bytes_accessed=B * C * N * itemsize + B * C * itemsize,
        ),
    )(x)


def global_feature_aggregation(
    x: jax.Array,
    *,
    tb: int | None = None,
    tn: int | None = None,
    use_pallas: bool | None = None,
    min_pallas_elements: int = 1 << 16,
) -> jax.Array:
    """x: (B, C, N) -> (B, C); equal to torch.max(x, 2)[0].view(B, -1)."""
    B, C, N = x.shape

    if use_pallas is None:
        use_pallas = (B * C * N) >= min_pallas_elements
    if not use_pallas:
        # Tiny inputs: launch/per-step overhead dominates; let XLA fuse it.
        return jnp.max(x, axis=2)

    auto_tb, auto_tn = _pick_tiles(B, C, N, x.dtype.itemsize)
    tb = auto_tb if tb is None else int(tb)
    tn = auto_tn if tn is None else int(tn)
    assert tb == B or tb % 8 == 0, "tb must equal B or be a multiple of 8"
    assert tn % _LANE == 0, "tn must be a multiple of 128"

    return _global_max_pallas(x, tb, tn)


if __name__ == "__main__":
    key = jax.random.PRNGKey(0)

    # Main check: forces the Pallas path, with a small tn so the reduction axis
    # has several grid steps and the final block is partial (exercises masking).
    B, C, N = 3, 64, 600
    x = jax.random.normal(key, (B, C, N), dtype=jnp.float32)

    out = global_feature_aggregation(x, tn=256, use_pallas=True)
    out = jax.block_until_ready(out)
    ref = jnp.max(x, axis=2)
    assert out.shape == (B, C), out.shape
    assert jnp.allclose(out, ref), "f32 mismatch vs reference"

    # bf16 path (max is exact in any dtype; halves HBM bytes for this kernel).
    x_bf16 = x.astype(jnp.bfloat16)
    out_bf16 = jax.block_until_ready(
        global_feature_aggregation(x_bf16, tn=256, use_pallas=True)
    )
    assert jnp.array_equal(out_bf16, jnp.max(x_bf16, axis=2)), "bf16 mismatch"

    # Tiny-shape auto-dispatch falls back to jnp.max (no Pallas launch).
    x_small = jax.random.normal(jax.random.PRNGKey(1), (2, 8, 40), jnp.float32)
    out_small = jax.block_until_ready(global_feature_aggregation(x_small))
    assert jnp.allclose(out_small, jnp.max(x_small, axis=2)), "fallback mismatch"

    print("KERNEL_OK")
</pallas_src>

<mosaic_0001>
module attributes {stable_mosaic.version = 11 : i64} {
  func.func @kernel(%arg0: i32, %arg1: i32, %arg2: memref<3x64x256xf32, #tpu.memory_space<vmem>>, %arg3: memref<3x64xf32, #tpu.memory_space<vmem>>, %arg4: memref<3x64x128xf32, #tpu.memory_space<vmem>>) attributes {dimension_semantics = [#tpu.dimension_semantics<parallel>, #tpu.dimension_semantics<arbitrary>], iteration_bounds = array<i64: 1, 3>, scalar_prefetch = 0 : i64, scratch_operands = 1 : i64, tpu.core_type = #tpu.core_type<tc>, window_params = [{transform_indices = @transform_0, window_bounds = array<i64: 3, 64, 256>}, {transform_indices = @transform_1, window_bounds = array<i64: 3, 64>}]} {
    %c0_i32 = arith.constant 0 : i32
    %0 = arith.cmpi eq, %arg1, %c0_i32 : i32
    %1 = arith.extui %0 : i1 to i32
    %c0_i32_0 = arith.constant 0 : i32
    %2 = arith.cmpi ne, %1, %c0_i32_0 : i32
    scf.if %2 {
      %cst = arith.constant 0xFF800000 : f32
      %12 = vector.broadcast %cst : f32 to vector<3x64x128xf32>
      %c0 = arith.constant 0 : index
      %c0_6 = arith.constant 0 : index
      %c0_7 = arith.constant 0 : index
      %13 = vector.load %arg4[%c0, %c0_6, %c0_7] : memref<3x64x128xf32, #tpu.memory_space<vmem>>, vector<3x64x128xf32>
      tpu.vector_store %arg4[%c0, %c0_6, %c0_7], %12 {strides = array<i32>} : memref<3x64x128xf32, #tpu.memory_space<vmem>>, vector<3x64x128xf32>,
    } else {
    }
    %c2_i32 = arith.constant 2 : i32
    %3 = arith.cmpi ne, %arg1, %c2_i32 : i32
    %4 = arith.extui %3 : i1 to i32
    %c0_i32_1 = arith.constant 0 : i32
    %5 = arith.cmpi ne, %4, %c0_i32_1 : i32
    scf.if %5 {
      %c0 = arith.constant 0 : index
      %c0_6 = arith.constant 0 : index
      %c0_7 = arith.constant 0 : index
      %12 = vector.load %arg2[%c0, %c0_6, %c0_7] : memref<3x64x256xf32, #tpu.memory_space<vmem>>, vector<3x64x128xf32>
      %c0_8 = arith.constant 0 : index
      %c0_9 = arith.constant 0 : index
      %c0_10 = arith.constant 0 : index
      %13 = vector.load %arg4[%c0_8, %c0_9, %c0_10] : memref<3x64x128xf32, #tpu.memory_space<vmem>>, vector<3x64x128xf32>
      %14 = arith.maximumf %13, %12 : vector<3x64x128xf32>
      %c0_11 = arith.constant 0 : index
      %c0_12 = arith.constant 0 : index
      %c0_13 = arith.constant 0 : index
      %15 = vector.load %arg4[%c0_11, %c0_12, %c0_13] : memref<3x64x128xf32, #tpu.memory_space<vmem>>, vector<3x64x128xf32>
      tpu.vector_store %arg4[%c0_11, %c0_12, %c0_13], %14 {strides = array<i32>} : memref<3x64x128xf32, #tpu.memory_space<vmem>>, vector<3x64x128xf32>,
      %c0_14 = arith.constant 0 : index
      %c0_15 = arith.constant 0 : index
      %c128 = arith.constant 128 : index
      %16 = vector.load %arg2[%c0_14, %c0_15, %c128] : memref<3x64x256xf32, #tpu.memory_space<vmem>>, vector<3x64x128xf32>
      %c0_16 = arith.constant 0 : index
      %c0_17 = arith.constant 0 : index
      %c0_18 = arith.constant 0 : index
      %17 = vector.load %arg4[%c0_16, %c0_17, %c0_18] : memref<3x64x128xf32, #tpu.memory_space<vmem>>, vector<3x64x128xf32>
      %18 = arith.maximumf %17, %16 : vector<3x64x128xf32>
      %c0_19 = arith.constant 0 : index
      %c0_20 = arith.constant 0 : index
      %c0_21 = arith.constant 0 : index
      %19 = vector.load %arg4[%c0_19, %c0_20, %c0_21] : memref<3x64x128xf32, #tpu.memory_space<vmem>>, vector<3x64x128xf32>
      tpu.vector_store %arg4[%c0_19, %c0_20, %c0_21], %18 {strides = array<i32>} : memref<3x64x128xf32, #tpu.memory_space<vmem>>, vector<3x64x128xf32>,
    } else {
    }
    %c2_i32_2 = arith.constant 2 : i32
    %6 = arith.cmpi eq, %arg1, %c2_i32_2 : i32
    %7 = arith.extui %6 : i1 to i32
    %c0_i32_3 = arith.constant 0 : i32
    %8 = arith.cmpi ne, %7, %c0_i32_3 : i32
    scf.if %8 {
      %c0 = arith.constant 0 : index
      %c0_6 = arith.constant 0 : index
      %c0_7 = arith.constant 0 : index
      %12 = vector.load %arg2[%c0, %c0_6, %c0_7] : memref<3x64x256xf32, #tpu.memory_space<vmem>>, vector<3x64x128xf32>
      %13 = tpu.iota {dimensions = array<i32: 2>} : vector<3x64x128xi32>
      %c88_i32 = arith.constant 88 : i32
      %14 = vector.broadcast %c88_i32 : i32 to vector<3x64x128xi32>
      %15 = arith.cmpi slt, %13, %14 : vector<3x64x128xi32>
      %cst = arith.constant 0xFF800000 : f32
      %16 = vector.broadcast %cst : f32 to vector<3x64x128xf32>
      %17 = arith.select %15, %12, %16 : vector<3x64x128xi1>, vector<3x64x128xf32>
      %c0_8 = arith.constant 0 : index
      %c0_9 = arith.constant 0 : index
      %c0_10 = arith.constant 0 : index
      %18 = vector.load %arg4[%c0_8, %c0_9, %c0_10] : memref<3x64x128xf32, #tpu.memory_space<vmem>>, vector<3x64x128xf32>
      %19 = arith.maximumf %18, %17 : vector<3x64x128xf32>
      %c0_11 = arith.constant 0 : index
      %c0_12 = arith.constant 0 : index
      %c0_13 = arith.constant 0 : index
      %20 = vector.load %arg4[%c0_11, %c0_12, %c0_13] : memref<3x64x128xf32, #tpu.memory_space<vmem>>, vector<3x64x128xf32>
      tpu.vector_store %arg4[%c0_11, %c0_12, %c0_13], %19 {strides = array<i32>} : memref<3x64x128xf32, #tpu.memory_space<vmem>>, vector<3x64x128xf32>,
    } else {
    }
    %c2_i32_4 = arith.constant 2 : i32
    %9 = arith.cmpi eq, %arg1, %c2_i32_4 : i32
    %10 = arith.extui %9 : i1 to i32
    %c0_i32_5 = arith.constant 0 : i32
    %11 = arith.cmpi ne, %10, %c0_i32_5 : i32
    scf.if %11 {
      %c0 = arith.constant 0 : index
      %c0_6 = arith.constant 0 : index
      %c0_7 = arith.constant 0 : index
      %12 = vector.load %arg4[%c0, %c0_6, %c0_7] : memref<3x64x128xf32, #tpu.memory_space<vmem>>, vector<3x64x128xf32>
      %cst = arith.constant dense<0xFF800000> : vector<3x64xf32>
      %13 = vector.multi_reduction <maximumf>, %12, %cst [2] : vector<3x64x128xf32> to vector<3x64xf32>
      %c0_8 = arith.constant 0 : index
      %c0_9 = arith.constant 0 : index
      %14 = vector.load %arg3[%c0_8, %c0_9] : memref<3x64xf32, #tpu.memory_space<vmem>>, vector<3x64xf32>
      tpu.vector_store %arg3[%c0_8, %c0_9], %13 {strides = array<i32>} : memref<3x64xf32, #tpu.memory_space<vmem>>, vector<3x64xf32>,
    } else {
    }
    return
  }
  func.func @transform_0(%arg0: i32, %arg1: i32) -> (i32, i32, i32) {
    %c0_i32 = arith.constant 0 : i32
    %c0_i32_0 = arith.constant 0 : i32
    return %arg0, %c0_i32, %arg1 : i32, i32, i32
  }
  func.func @transform_1(%arg0: i32, %arg1: i32) -> (i32, i32) {
    %c0_i32 = arith.constant 0 : i32
    %c0_i32_0 = arith.constant 0 : i32
    return %arg0, %c0_i32 : i32, i32
  }
}

</mosaic_0001>

<bundles_post_ra>
// kernel: tpu_custom_call.1
= control target key start
LH: loop header
LB: loop body
LE: loop exit
PB: predicated region body
PF: predicated region fallthrough
CT: control target
= control target key end

     0   :  { %6 = vsyncpa [#allocation4], 0  ;;  %s1236_s0 = inlined_call_operand.hbm [shape: f32[3,64,600], index: 0, kind: input, shape index: {}]   ;;  %s1237_s1 = inlined_call_operand.hbm [shape: f32[3,64], index: 1, kind: output, shape index: {}]  }
   0x1   :  { %8 = vsyncpa [#allocation4 + $0x1], 0 }
   0x2   :  { %9 = vsyncpa [#allocation5], 0  ;;  %s966_s6 = smov 0   ;;  %s968_s7 = smov 0  }
   0x3   :  { %s970_s8 = smov 0   ;;  %s972_s9 = smov 0  }
   0x4   :  { %s974_s10 = smov 0   ;;  %s976_s11 = smov 0  }
   0x5 LB: > { %s749_s12 = sadd.s32 4294967295, %s949_s11   ;;  %s24_s13 = sadd.s32 1, %s945_s10  ;;  %s949_s11 = sphi %s976_s11, %s15_s11   ;;  %s945_s10 = sphi %s974_s10, %s1244_s10   ;;  %s941_s9 = sphi %s972_s9, %s1243_s9   ;;  %s937_s8 = sphi %s970_s8, %s1242_s8   ;;  %s933_s7 = sphi %s968_s7, %s1241_s7   ;;  %s929_s6 = sphi %s966_s6, %s1240_s6  }
   0x6   : > { %p25_p0 = scmp.ge.s32.totalorder %s24_s13, 3  ;;  %s36_s14 = sadd.s32 1, %s937_s8 }
   0x7   : > { %p43_p1 = scmp.ne.s32.totalorder %s937_s8, %s933_s7  ;;  %p44_p2 = scmp.eq.s32.totalorder %s949_s11, 0 }
   0x8   : > { %s1246_s13 = smov (%p25_p0, %s24_s13), 0  ;;  %p49_p4 = scmp.ne.s32.totalorder %s933_s7, %s929_s6 }
   0x9   : > { %p45_p3 = por %p44_p2, %p43_p1  ;;  %s32_s15 = ssub.s32 %s945_s10, %s1246_s13 }
   0xa   : > { %p50_p5 = scmp.eq.s32.totalorder %s749_s12, 0  ;;  %p34_p6 = scmp.eq.s32.totalorder %s32_s15, 0 }
   0xb   : > { %p751_p8 = scmp.ge.s32.totalorder %s949_s11, 3 }
   0xc   : > { %p1007_p7 = por %p50_p5, %p49_p4 }
   0xd   : > { %s1012_s17 = scalar_select %p34_p6, %s937_s8, %s36_s14  }
   0xe   : > { %95 = sbr.rel (%p751_p8) target bundleno = 51 (0x33), region = 16 }
  0x13   : > { %98 = sbr.rel (!%p45_p3) target bundleno = 51 (0x33), region = 20  ;;  %s99_s18 = sand.u32 (%p45_p3), 1, %s937_s8  }
  0x14   : > { %s752_s19 = sshll.u32 (%p45_p3), %s945_s10, 1  ;;  %s767_s20 = smul.u32 (%p45_p3), 384, %s99_s18 }
  0x15   : > { %s106_s21 = ssub.s32 (%p45_p3), 5, %s752_s19  ;;  %s1020_s25 = scalar_lea.sflag (%p45_p3), [#allocation4], %s99_s18 }
  0x16   : > { %p107_p9 = scmp.lt.s32.totalorder (%p45_p3), %s106_s21, 2  ;;  %s103_s26 = scalar_lea.vmem (%p45_p3), [#allocation3], %s767_s20 }
  0x18   : > { %s1248_s21 = smov (!%p107_p9, %s106_s21), 2 }
  0x19   : > { %s109_s22 = smul.u32 192, %s1248_s21 }
  0x1b   : > { %s110_s23 = ssub.s32 384, %s109_s22 }
  0x1c   : > { %s111_s24 = sshll.u32 %s110_s23, 4 }
  0x1d   : > { %112 = vsyncadd %s1020_s25, %s111_s24  ;;  %p1023_p10 = scmp.ne.s32.totalorder %s109_s22, 0  ;;  %s766_s28 = sshll.u32 %s945_s10, 4 }
  0x1e   : > { %s117_s2 = scalar_lea.hbm %s1236_s0, %s766_s28  ;;  %s755_s3 = sshll.u32 %s1248_s21, 3 }
  0x1f   : > { %s120_s4 = sshll.u32 %s117_s2, 4  ;;  %s122_s5 = sshll.u32 %s103_s26, 4  ;;  %s121_s4 = int_to_ptr.hbm [resolvable:$true] %s120_s4  ;;  %s123_s5 = int_to_ptr.vmem [resolvable:$true] %s122_s5 }
  0x20   : > { %s757_s6 = smul.u32 3072, %s1248_s21  ;;  %s847_s19 = sshra.s32 %s123_s5, 4  ;;  %s848_s19 = int_to_ptr.vmem [resolvable:$true] %s847_s19 }
  0x21   : > { %s951_s22 = smov [#allocation3]  }
  0x22   : > { %s830_s14 = sshrl.u32 %s757_s6, 4  ;;  %s858_s23 = scalar_lea.vmem %s951_s22, 768 }
  0x23   : > { %s866_s15 = sshll.u32 %s830_s14, 4  ;;  %s833_s18 = sadd.s32 1, %s830_s14 }
  0x24   : > { %p832_p11 = scmp.ne.s32.totalorder %s866_s15, %s757_s6 }
  0x26   : > { %s1250_s18 = smov (!%p832_p11, %s833_s18), %s830_s14 }
  0x27   : > { %s854_s20 = scalar_lea.vmem %s848_s19, %s1250_s18 }
  0x28   : > { %p855_p12 = scmp.ne.s32.totalorder %s848_s19, %s854_s20  ;;  %p860_p1 = scmp.lt.s32.totalorder %s858_s23, %s854_s20 }
  0x2a   : > { %p856_p13 = pnand %p855_p12, %p1023_p10 }
  0x2c   : > { %p857_p0 = pneg %p856_p13 }
  0x2e   : > { %p862_p2 = pnand %p860_p1, %p857_p0 }
  0x30   : > { %865 = shalt.err (!%p862_p2)
}
  0x31   : > { %s952_s24 = smov 640   ;;  %s953_s26 = smov 256  }
  0x32   : > { %128 = dma.hbm_to_vmem [thread:$0]  (%p1023_p10), %s121_s4, %s757_s6, %s123_s5, %s1020_s25, %s952_s24, %s953_s26, %s755_s3  }
  0x33 PF: > { %p758_p3 = scmp.ge.s32.totalorder %s949_s11, 1  ;;  %p130_p4 = scmp.lt.s32.totalorder %s949_s11, 4 }
  0x35   : > { %p131_p5 = pnand %p758_p3, %p130_p4 }
  0x36   : > { %s136_s28 = sand.u32 (!%p131_p5), 1, %s933_s7  }
  0x37   : > { %134 = sbr.rel (%p131_p5) target bundleno = 331 (0x14b), region = 24  ;;  %s137_s30 = scalar_lea.sflag (!%p131_p5), [#allocation4], %s136_s28 }
  0x38   : > { %s768_s29 = smul.u32 (!%p131_p5), 384, %s136_s28 }
  0x3a   : > { %s1043_s2 = scalar_lea.vmem (!%p131_p5), [#allocation3], %s768_s29 }
  0x3c   : > { %920 = dma.done.wait (%p1007_p7), %s137_s30, 6144  }
  0x3d   : > { %922 = vsyncadd (%p1007_p7), %s137_s30, 4294961152  ;;  %p759_p6 = scmp.ne.s32.totalorder %s941_s9, 0 }
  0x3f   : > { %164 = sbr.rel (%p759_p6) target bundleno = 93 (0x5d), region = 32 }
  0x44   : > { %v954_v0 = vmov -inf  }
  0x45   : > { %165 = vst [vmem:[#allocation2 + $0xb0] sm:$0xff] %v954_v0 }
  0x46   : > { %166 = vst [vmem:[#allocation2] sm:$0xff] %v954_v0 }
  0x47   : > { %167 = vst [vmem:[#allocation2 + $0x10] sm:$0xff] %v954_v0 }
  0x48   : > { %168 = vst [vmem:[#allocation2 + $0x48] sm:$0xff] %v954_v0 }
  0x49   : > { %169 = vst [vmem:[#allocation2 + $0x60] sm:$0xff] %v954_v0 }
  0x4a   : > { %170 = vst [vmem:[#allocation2 + $0x28] sm:$0xff] %v954_v0 }
  0x4b   : > { %171 = vst [vmem:[#allocation2 + $0x40] sm:$0xff] %v954_v0 }
  0x4c   : > { %172 = vst [vmem:[#allocation2 + $0x78] sm:$0xff] %v954_v0 }
  0x4d   : > { %173 = vst [vmem:[#allocation2 + $0x88] sm:$0xff] %v954_v0 }
  0x4e   : > { %174 = vst [vmem:[#allocation2 + $0x90] sm:$0xff] %v954_v0 }
  0x4f   : > { %175 = vst [vmem:[#allocation2 + $0x18] sm:$0xff] %v954_v0 }
  0x50   : > { %176 = vst [vmem:[#allocation2 + $0x98] sm:$0xff] %v954_v0 }
  0x51   : > { %177 = vst [vmem:[#allocation2 + $0x38] sm:$0xff] %v954_v0 }
  0x52   : > { %178 = vst [vmem:[#allocation2 + $0x50] sm:$0xff] %v954_v0 }
  0x53   : > { %179 = vst [vmem:[#allocation2 + $0x70] sm:$0xff] %v954_v0 }
  0x54   : > { %180 = vst [vmem:[#allocation2 + $0xa0] sm:$0xff] %v954_v0 }
  0x55   : > { %181 = vst [vmem:[#allocation2 + $0xa8] sm:$0xff] %v954_v0 }
  0x56   : > { %182 = vst [vmem:[#allocation2 + $0x68] sm:$0xff] %v954_v0 }
  0x57   : > { %183 = vst [vmem:[#allocation2 + $0x30] sm:$0xff] %v954_v0 }
  0x58   : > { %184 = vst [vmem:[#allocation2 + $0x58] sm:$0xff] %v954_v0 }
  0x59   : > { %185 = vst [vmem:[#allocation2 + $0x80] sm:$0xff] %v954_v0 }
  0x5a   : > { %186 = vst [vmem:[#allocation2 + $0xb8] sm:$0xff] %v954_v0 }
  0x5b   : > { %187 = vst [vmem:[#allocation2 + $0x20] sm:$0xff] %v954_v0 }
  0x5c   : > { %188 = vst [vmem:[#allocation2 + $0x8] sm:$0xff] %v954_v0 }
  0x5d PF: > { %p760_p7 = scmp.eq.s32.totalorder %s941_s9, 2 }
  0x5f   : > { %192 = sbr.rel (%p760_p7) target bundleno = 131 (0x83), region = 36 }
  0x64   : > { %v193_v1 = vld [vmem:[%s1043_s2] sm:$0xff]  ;;  %v217_v2 = vld [vmem:[#allocation2 + $0xb0] sm:$0xff]  ;;  %v220_v8 = vld [vmem:[#allocation2 + $0x48] sm:$0xff] }
  0x65   : > { %v194_v3 = vld [vmem:[%s1043_s2 + $0x10] sm:$0xff]  ;;  %v218_v4 = vld [vmem:[#allocation2] sm:$0xff]  ;;  %v241_v12 = vmax.f32 %v217_v2, %v193_v1  ;;  %v222_v15 = vld [vmem:[#allocation2 + $0x28] sm:$0xff] }
  0x66   : > { %v195_v5 = vld [vmem:[%s1043_s2 + $0x20] sm:$0xff]  ;;  %v219_v6 = vld [vmem:[#allocation2 + $0x10] sm:$0xff]  ;;  %v242_v13 = vmax.f32 %v218_v4, %v194_v3  ;;  %v224_v20 = vld [vmem:[#allocation2 + $0x78] sm:$0xff] }
  0x67   : > { %v196_v7 = vld [vmem:[%s1043_s2 + $0x30] sm:$0xff]  ;;  %v197_v9 = vld [vmem:[%s1043_s2 + $0x40] sm:$0xff]  ;;  %v243_v14 = vmax.f32 %v219_v6, %v195_v5  ;;  %v225_v23 = vld [vmem:[#allocation2 + $0x88] sm:$0xff] }
  0x68   : > { %v221_v10 = vld [vmem:[#allocation2 + $0x60] sm:$0xff]  ;;  %v198_v11 = vld [vmem:[%s1043_s2 + $0x50] sm:$0xff]  ;;  %v244_v18 = vmax.f32 %v220_v8, %v196_v7  ;;  %v289_v27 = vld [vmem:[%s1043_s2 + $0x8] sm:$0xff] }
  0x69   : > { %v199_v16 = vld [vmem:[%s1043_s2 + $0x60] sm:$0xff]  ;;  %v200_v19 = vld [vmem:[%s1043_s2 + $0x70] sm:$0xff]  ;;  %v245_v22 = vmax.f32 %v221_v10, %v197_v9  ;;  %v246_v26 = vmax.f32 %v222_v15, %v198_v11  ;;  %v290_v28 = vld [vmem:[%s1043_s2 + $0x18] sm:$0xff]  ;;  %v337_v31 = vmax.f32 %v241_v12, %v289_v27 }
  0x6a   : > { %v223_v17 = vld [vmem:[#allocation2 + $0x40] sm:$0xff]  ;;  %v202_v24 = vld [vmem:[%s1043_s2 + $0x90] sm:$0xff]  ;;  %v291_v29 = vld [vmem:[%s1043_s2 + $0x28] sm:$0xff]  ;;  %v338_v32 = vmax.f32 %v242_v13, %v290_v28  ;;  %v248_v37 = vmax.f32 %v224_v20, %v200_v19 }
  0x6b   : > { %v201_v21 = vld [vmem:[%s1043_s2 + $0x80] sm:$0xff]  ;;  %v226_v25 = vld [vmem:[#allocation2 + $0x90] sm:$0xff]  ;;  %v247_v30 = vmax.f32 %v223_v17, %v199_v16  ;;  %v339_v33 = vmax.f32 %v243_v14, %v291_v29  ;;  %v292_v34 = vld [vmem:[%s1043_s2 + $0x38] sm:$0xff]  ;;  %361 = vst [vmem:[#allocation2 + $0xb0] sm:$0xff] %v337_v31 }
  0x6c   : > { %v293_v35 = vld [vmem:[%s1043_s2 + $0x48] sm:$0xff]  ;;  %v294_v36 = vld [vmem:[%s1043_s2 + $0x58] sm:$0xff]  ;;  %v203_v38 = vld [vmem:[%s1043_s2 + $0xa0] sm:$0xff]  ;;  %v340_v40 = vmax.f32 %v244_v18, %v292_v34  ;;  %v249_v42 = vmax.f32 %v225_v23, %v201_v21  ;;  %v250_v47 = vmax.f32 %v226_v25, %v202_v24  ;;  %362 = vst [vmem:[#allocation2] sm:$0xff] %v338_v32 }
  0x6d   : > { %v227_v39 = vld [vmem:[#allocation2 + $0x18] sm:$0xff]  ;;  %v295_v41 = vld [vmem:[%s1043_s2 + $0x68] sm:$0xff]  ;;  %v204_v43 = vld [vmem:[%s1043_s2 + $0xb0] sm:$0xff]  ;;  %v341_v45 = vmax.f32 %v245_v22, %v293_v35  ;;  %v342_v50 = vmax.f32 %v246_v26, %v294_v36  ;;  %363 = vst [vmem:[#allocation2 + $0x10] sm:$0xff] %v339_v33 }
  0x6e   : > { %v228_v44 = vld [vmem:[#allocation2 + $0x98] sm:$0xff]  ;;  %v205_v48 = vld [vmem:[%s1043_s2 + $0xc0] sm:$0xff]  ;;  %v297_v51 = vld [vmem:[%s1043_s2 + $0x88] sm:$0xff]  ;;  %v251_v52 = vmax.f32 %v227_v39, %v203_v38  ;;  %v343_v55 = vmax.f32 %v247_v30, %v295_v41  ;;  %364 = vst [vmem:[#allocation2 + $0x48] sm:$0xff] %v340_v40 }
  0x6f   : > { %v296_v46 = vld [vmem:[%s1043_s2 + $0x78] sm:$0xff]  ;;  %v206_v53 = vld [vmem:[%s1043_s2 + $0xd0] sm:$0xff]  ;;  %v252_v57 = vmax.f32 %v228_v44, %v204_v43  ;;  %v207_v58 = vld [vmem:[%s1043_s2 + $0xe0] sm:$0xff]  ;;  %365 = vst [vmem:[#allocation2 + $0x60] sm:$0xff] %v341_v45  ;;  %v345_v1 = vmax.f32 %v249_v42, %v297_v51 }
  0x70   : > { %v229_v49 = vld [vmem:[#allocation2 + $0x38] sm:$0xff]  ;;  %v230_v54 = vld [vmem:[#allocation2 + $0x50] sm:$0xff]  ;;  %v344_v60 = vmax.f32 %v248_v37, %v296_v46  ;;  %v299_v61 = vld [vmem:[%s1043_s2 + $0xa8] sm:$0xff]  ;;  %366 = vst [vmem:[#allocation2 + $0x28] sm:$0xff] %v342_v50 }
  0x71   : > { %v298_v56 = vld [vmem:[%s1043_s2 + $0x98] sm:$0xff]  ;;  %v231_v59 = vld [vmem:[#allocation2 + $0x70] sm:$0xff]  ;;  %v253_v62 = vmax.f32 %v229_v49, %v205_v48  ;;  %v232_v0 = vld [vmem:[#allocation2 + $0xa0] sm:$0xff]  ;;  %v254_v3 = vmax.f32 %v230_v54, %v206_v53  ;;  %367 = vst [vmem:[#allocation2 + $0x40] sm:$0xff] %v343_v55  ;;  %v347_v11 = vmax.f32 %v251_v52, %v299_v61 }
  0x72   : > { %v208_v63 = vld [vmem:[%s1043_s2 + $0xf0] sm:$0xff]  ;;  %v300_v2 = vld [vmem:[%s1043_s2 + $0xb8] sm:$0xff]  ;;  %v209_v4 = vld [vmem:[%s1043_s2 + $0x100] sm:$0xff]  ;;  %v346_v6 = vmax.f32 %v250_v47, %v298_v56  ;;  %v255_v8 = vmax.f32 %v231_v59, %v207_v58  ;;  %368 = vst [vmem:[#allocation2 + $0x78] sm:$0xff] %v344_v60 }
  0x73   : > { %v233_v5 = vld [vmem:[#allocation2 + $0xa8] sm:$0xff]  ;;  %v210_v9 = vld [vmem:[%s1043_s2 + $0x110] sm:$0xff]  ;;  %v302_v12 = vld [vmem:[%s1043_s2 + $0xd8] sm:$0xff]  ;;  %v256_v13 = vmax.f32 %v232_v0, %v208_v63  ;;  %v348_v16 = vmax.f32 %v252_v57, %v300_v2  ;;  %369 = vst [vmem:[#allocation2 + $0x88] sm:$0xff] %v345_v1 }
  0x74   : > { %v301_v7 = vld [vmem:[%s1043_s2 + $0xc8] sm:$0xff]  ;;  %v211_v14 = vld [vmem:[%s1043_s2 + $0x120] sm:$0xff]  ;;  %v235_v15 = vld [vmem:[#allocation2 + $0x30] sm:$0xff]  ;;  %v257_v18 = vmax.f32 %v233_v5, %v209_v4  ;;  %370 = vst [vmem:[#allocation2 + $0x90] sm:$0xff] %v346_v6  ;;  %v350_v26 = vmax.f32 %v254_v3, %v302_v12 }
  0x75   : > { %v234_v10 = vld [vmem:[#allocation2 + $0x68] sm:$0xff]  ;;  %v212_v19 = vld [vmem:[%s1043_s2 + $0x130] sm:$0xff]  ;;  %v236_v20 = vld [vmem:[#allocation2 + $0x58] sm:$0xff]  ;;  %v349_v21 = vmax.f32 %v253_v62, %v301_v7  ;;  %v259_v28 = vmax.f32 %v235_v15, %v211_v14  ;;  %371 = vst [vmem:[#allocation2 + $0x18] sm:$0xff] %v347_v11 }
  0x76   : > { %v303_v17 = vld [vmem:[%s1043_s2 + $0xe8] sm:$0xff]  ;;  %v304_v22 = vld [vmem:[%s1043_s2 + $0xf8] sm:$0xff]  ;;  %v258_v23 = vmax.f32 %v234_v10, %v210_v9  ;;  %v213_v24 = vld [vmem:[%s1043_s2 + $0x140] sm:$0xff]  ;;  %v260_v33 = vmax.f32 %v236_v20, %v212_v19  ;;  %372 = vst [vmem:[#allocation2 + $0x98] sm:$0xff] %v348_v16 }
  0x77   : > { %v237_v25 = vld [vmem:[#allocation2 + $0x80] sm:$0xff]  ;;  %v305_v27 = vld [vmem:[%s1043_s2 + $0x108] sm:$0xff]  ;;  %v214_v29 = vld [vmem:[%s1043_s2 + $0x150] sm:$0xff]  ;;  %v351_v31 = vmax.f32 %v255_v8, %v303_v17  ;;  %v352_v36 = vmax.f32 %v256_v13, %v304_v22  ;;  %373 = vst [vmem:[#allocation2 + $0x38] sm:$0xff] %v349_v21 }
  0x78   : > { %v238_v30 = vld [vmem:[#allocation2 + $0xb8] sm:$0xff]  ;;  %v215_v34 = vld [vmem:[%s1043_s2 + $0x160] sm:$0xff]  ;;  %v307_v37 = vld [vmem:[%s1043_s2 + $0x128] sm:$0xff]  ;;  %v261_v38 = vmax.f32 %v237_v25, %v213_v24  ;;  %v353_v41 = vmax.f32 %v257_v18, %v305_v27  ;;  %374 = vst [vmem:[#allocation2 + $0x50] sm:$0xff] %v350_v26 }
  0x79   : > { %v306_v32 = vld [vmem:[%s1043_s2 + $0x118] sm:$0xff]  ;;  %v239_v35 = vld [vmem:[#allocation2 + $0x20] sm:$0xff]  ;;  %v216_v39 = vld [vmem:[%s1043_s2 + $0x170] sm:$0xff]  ;;  %v262_v43 = vmax.f32 %v238_v30, %v214_v29  ;;  %375 = vst [vmem:[#allocation2 + $0x70] sm:$0xff] %v351_v31  ;;  %v355_v47 = vmax.f32 %v259_v28, %v307_v37 }
  0x7a   : > { %v240_v40 = vld [vmem:[#allocation2 + $0x8] sm:$0xff]  ;;  %v308_v42 = vld [vmem:[%s1043_s2 + $0x138] sm:$0xff]  ;;  %v354_v44 = vmax.f32 %v258_v23, %v306_v32  ;;  %v263_v46 = vmax.f32 %v239_v35, %v215_v34  ;;  %376 = vst [vmem:[#allocation2 + $0xa0] sm:$0xff] %v352_v36 }
  0x7b   : > { %v309_v45 = vld [vmem:[%s1043_s2 + $0x148] sm:$0xff]  ;;  %v310_v48 = vld [vmem:[%s1043_s2 + $0x158] sm:$0xff]  ;;  %v264_v49 = vmax.f32 %v240_v40, %v216_v39  ;;  %v356_v50 = vmax.f32 %v260_v33, %v308_v42  ;;  %377 = vst [vmem:[#allocation2 + $0xa8] sm:$0xff] %v353_v41 }
  0x7c   : > { %v311_v51 = vld [vmem:[%s1043_s2 + $0x168] sm:$0xff]  ;;  %v357_v52 = vmax.f32 %v261_v38, %v309_v45  ;;  %v312_v53 = vld [vmem:[%s1043_s2 + $0x178] sm:$0xff]  ;;  %378 = vst [vmem:[#allocation2 + $0x68] sm:$0xff] %v354_v44  ;;  %v358_v54 = vmax.f32 %v262_v43, %v310_v48 }
  0x7d   : > { %379 = vst [vmem:[#allocation2 + $0x30] sm:$0xff] %v355_v47  ;;  %v359_v55 = vmax.f32 %v263_v46, %v311_v51  ;;  %v360_v56 = vmax.f32 %v264_v49, %v312_v53 }
  0x7e   : > { %380 = vst [vmem:[#allocation2 + $0x58] sm:$0xff] %v356_v50 }
  0x7f   : > { %381 = vst [vmem:[#allocation2 + $0x80] sm:$0xff] %v357_v52 }
  0x80   : > { %382 = vst [vmem:[#allocation2 + $0xb8] sm:$0xff] %v358_v54 }
  0x81   : > { %383 = vst [vmem:[#allocation2 + $0x20] sm:$0xff] %v359_v55 }
  0x82   : > { %384 = vst [vmem:[#allocation2 + $0x8] sm:$0xff] %v360_v56 }
  0x83 PF: > { %p761_p8 = scmp.ne.s32.totalorder %s941_s9, 2 }
  0x85   : > { %388 = sbr.rel (%p761_p8) target bundleno = 325 (0x145), region = 40 }
  0x8a   : > { %v413_v57 = vlaneseq  ;;  %v393_v58 = vld [vmem:[%s1043_s2 + $0x40] sm:$0xff]  ;;  %v442_v63 = vld [vmem:[#allocation2 + $0x10] sm:$0xff]  ;;  %v445_v11 = vld [vmem:[#allocation2 + $0x28] sm:$0xff]  ;;  %vm611_vm1 = vcmask 130112   ;;  %vm615_vm2 = vcmask 195712   ;;  %vm619_vm3 = vcmask 261312  }
  0x8b   : > { %v444_v60 = vld [vmem:[#allocation2 + $0x60] sm:$0xff]  ;;  %v440_v0 = vld [vmem:[#allocation2 + $0xb0] sm:$0xff]  ;;  %v443_v14 = vld [vmem:[#allocation2 + $0x48] sm:$0xff]  ;;  %vm623_vm4 = vcmask 326912   ;;  %vm627_vm5 = vcmask 392512   ;;  %vm631_vm6 = vcmask 458112  }
  0x8c   : > { %v1101_v59 = vand.u32 127, %v413_v57  ;;  %v391_v61 = vld [vmem:[%s1043_s2 + $0x20] sm:$0xff]  ;;  %v394_v1 = vld [vmem:[%s1043_s2 + $0x50] sm:$0xff]  ;;  %v448_v25 = vld [vmem:[#allocation2 + $0x88] sm:$0xff]  ;;  %vm635_vm7 = vcmask 523712   ;;  %vm667_vm8 = vcmask 1041409  }
  0x8d   : > { %v389_v62 = vld [vmem:[%s1043_s2] sm:$0xff]  ;;  %v392_v2 = vld [vmem:[%s1043_s2 + $0x30] sm:$0xff]  ;;  %v457_v33 = vld [vmem:[#allocation2 + $0x68] sm:$0xff]  ;;  %vm669_vm9 = vcmask 1042434   ;;  %vm672_vm10 = vcmask 518144  }
  0x8e   : > { %vm415_vm0 = vcmp.lt.s32.totalorder %v1101_v59, 88  ;;  %v390_v6 = vld [vmem:[%s1043_s2 + $0x10] sm:$0xff]  ;;  %v397_v15 = vld [vmem:[%s1043_s2 + $0x80] sm:$0xff]  ;;  %v456_v37 = vld [vmem:[#allocation2 + $0xa8] sm:$0xff] }
  0x8f   : > { %v420_v3 = vsel %vm415_vm0, %v393_v58, -inf  ;;  %v418_v4 = vsel %vm415_vm0, %v391_v61, -inf  ;;  %v416_v5 = vsel %vm415_vm0, %v389_v62, -inf  ;;  %v421_v10 = vsel %vm415_vm0, %v394_v1, -inf  ;;  %v398_v12 = vld [vmem:[%s1043_s2 + $0x90] sm:$0xff]  ;;  %v441_v17 = vld [vmem:[#allocation2] sm:$0xff] }
  0x90   : > { %v468_v7 = vmax.f32 %v444_v60, %v420_v3  ;;  %v466_v8 = vmax.f32 %v442_v63, %v418_v4  ;;  %v464_v9 = vmax.f32 %v440_v0, %v416_v5  ;;  %v419_v13 = vsel %vm415_vm0, %v392_v2, -inf  ;;  %v395_v18 = vld [vmem:[%s1043_s2 + $0x60] sm:$0xff]  ;;  %v449_v21 = vld [vmem:[#allocation2 + $0x90] sm:$0xff]  ;;  %v450_v41 = vld [vmem:[#allocation2 + $0x18] sm:$0xff] }
  0x91   : > { %v417_v16 = vsel %vm415_vm0, %v390_v6, -inf  ;;  %v469_v19 = vmax.f32 %v445_v11, %v421_v10  ;;  %v425_v20 = vsel %vm415_vm0, %v398_v12, -inf  ;;  %v406_v22 = vld [vmem:[%s1043_s2 + $0x110] sm:$0xff]  ;;  %v467_v23 = vmax.f32 %v443_v14, %v419_v13  ;;  %v405_v26 = vld [vmem:[%s1043_s2 + $0x100] sm:$0xff]  ;;  %v452_v45 = vld [vmem:[#allocation2 + $0x38] sm:$0xff] }
  0x92   : > { %492 = vst [vmem:[#allocation2 + $0x60] sm:$0xff] %v468_v7  ;;  %544 = vmax.xlane.f32.xlu2 %v468_v7  ;;  %540 = vmax.xlane.f32.xlu1 %v466_v8  ;;  %v424_v24 = vsel %vm415_vm0, %v397_v15, -inf  ;;  %v465_v27 = vmax.f32 %v441_v17, %v417_v16  ;;  %v422_v28 = vsel %vm415_vm0, %v395_v18, -inf  ;;  %v446_v29 = vld [vmem:[#allocation2 + $0x40] sm:$0xff]  ;;  %v473_v31 = vmax.f32 %v449_v21, %v425_v20  ;;  %v400_v42 = vld [vmem:[%s1043_s2 + $0xb0] sm:$0xff]  ;;  %v451_v53 = vld [vmem:[#allocation2 + $0x98] sm:$0xff] }
  0x93   : > { %490 = vst [vmem:[#allocation2 + $0x10] sm:$0xff] %v466_v8  ;;  %536 = vmax.xlane.f32.xlu0 %v464_v9  ;;  %v399_v30 = vld [vmem:[%s1043_s2 + $0xa0] sm:$0xff]  ;;  %v433_v32 = vsel %vm415_vm0, %v406_v22, -inf  ;;  %v472_v35 = vmax.f32 %v448_v25, %v424_v24  ;;  %v432_v36 = vsel %vm415_vm0, %v405_v26, -inf  ;;  %v470_v39 = vmax.f32 %v446_v29, %v422_v28  ;;  %v458_v49 = vld [vmem:[#allocation2 + $0x30] sm:$0xff]  ;;  %v459_v1 = vld [vmem:[#allocation2 + $0x58] sm:$0xff] }
  0x94   : > { %488 = vst [vmem:[#allocation2 + $0xb0] sm:$0xff] %v464_v9  ;;  %v401_v34 = vld [vmem:[%s1043_s2 + $0xc0] sm:$0xff]  ;;  %v426_v40 = vsel %vm415_vm0, %v399_v30, -inf  ;;  %v1142_v43 = vmax.f32 %v457_v33, %v433_v32  ;;  %v480_v47 = vmax.f32 %v456_v37, %v432_v36  ;;  %v402_v50 = vld [vmem:[%s1043_s2 + $0xd0] sm:$0xff]  ;;  %v427_v52 = vsel %vm415_vm0, %v400_v42, -inf  ;;  %v447_v4 = vld [vmem:[#allocation2 + $0x78] sm:$0xff] }
  0x95   : > { %493 = vst [vmem:[#allocation2 + $0x28] sm:$0xff] %v469_v19  ;;  %v407_v38 = vld [vmem:[%s1043_s2 + $0x120] sm:$0xff]  ;;  %v428_v44 = vsel %vm415_vm0, %v401_v34, -inf  ;;  %v474_v51 = vmax.f32 %v450_v41, %v426_v40  ;;  %v408_v54 = vld [vmem:[%s1043_s2 + $0x130] sm:$0xff]  ;;  %v429_v61 = vsel %vm415_vm0, %v402_v50, -inf  ;;  %v475_v63 = vmax.f32 %v451_v53, %v427_v52  ;;  %v461_v9 = vld [vmem:[#allocation2 + $0xb8] sm:$0xff] }
  0x96   : > { %491 = vst [vmem:[#allocation2 + $0x48] sm:$0xff] %v467_v23  ;;  %v409_v46 = vld [vmem:[%s1043_s2 + $0x140] sm:$0xff]  ;;  %v434_v48 = vsel %vm415_vm0, %v407_v38, -inf  ;;  %v476_v55 = vmax.f32 %v452_v45, %v428_v44  ;;  %v396_v58 = vld [vmem:[%s1043_s2 + $0x70] sm:$0xff]  ;;  %v435_v0 = vsel %vm415_vm0, %v408_v54, -inf  ;;  %v463_v26 = vld [vmem:[#allocation2 + $0x8] sm:$0xff] }
  0x97   : > { %489 = vst [vmem:[#allocation2] sm:$0xff] %v465_v27  ;;  %v436_v56 = vsel %vm415_vm0, %v409_v46, -inf  ;;  %v460_v57 = vld [vmem:[#allocation2 + $0x80] sm:$0xff]  ;;  %v482_v60 = vmax.f32 %v458_v49, %v434_v48  ;;  %v453_v62 = vld [vmem:[#allocation2 + $0x50] sm:$0xff]  ;;  %v423_v3 = vsel %vm415_vm0, %v396_v58, -inf  ;;  %v483_v10 = vmax.f32 %v459_v1, %v435_v0 }
  0x98   : > { %497 = vst [vmem:[#allocation2 + $0x90] sm:$0xff] %v473_v31  ;;  %v484_v2 = vmax.f32 %v460_v57, %v436_v56  ;;  %v410_v5 = vld [vmem:[%s1043_s2 + $0x150] sm:$0xff]  ;;  %v403_v6 = vld [vmem:[%s1043_s2 + $0xe0] sm:$0xff]  ;;  %v477_v7 = vmax.f32 %v453_v62, %v429_v61  ;;  %v471_v13 = vmax.f32 %v447_v4, %v423_v3  ;;  %v613_v45 = vadd.s32 4294967280, %v1101_v59 }
  0x99   : > { %496 = vst [vmem:[#allocation2 + $0x88] sm:$0xff] %v472_v35  ;;  %v437_v8 = vsel %vm415_vm0, %v410_v5, -inf  ;;  %v430_v11 = vsel %vm415_vm0, %v403_v6, -inf  ;;  %v454_v12 = vld [vmem:[#allocation2 + $0x70] sm:$0xff]  ;;  %v411_v15 = vld [vmem:[%s1043_s2 + $0x160] sm:$0xff]  ;;  %v617_v50 = vadd.s32 4294967272, %v1101_v59 }
  0x9a   : > { %546 = vmax.xlane.f32.xlu2 %v469_v19  ;;  %542 = vmax.xlane.f32.xlu1 %v467_v23  ;;  %494 = vst [vmem:[#allocation2 + $0x40] sm:$0xff] %v470_v39  ;;  %v485_v14 = vmax.f32 %v461_v9, %v437_v8  ;;  %v462_v16 = vld [vmem:[#allocation2 + $0x20] sm:$0xff]  ;;  %v478_v17 = vmax.f32 %v454_v12, %v430_v11  ;;  %v438_v18 = vsel %vm415_vm0, %v411_v15, -inf  ;;  %v404_v20 = vld [vmem:[%s1043_s2 + $0xf0] sm:$0xff]  ;;  %v621_v53 = vadd.s32 4294967264, %v1101_v59 }
  0x9b   : > { %538 = vmax.xlane.f32.xlu0 %v465_v27  ;;  %505 = vst [vmem:[#allocation2 + $0x68] sm:$0xff] %v1142_v43  ;;  %v486_v19 = vmax.f32 %v462_v16, %v438_v18  ;;  %v431_v21 = vsel %vm415_vm0, %v404_v20, -inf  ;;  %v455_v22 = vld [vmem:[#allocation2 + $0xa0] sm:$0xff]  ;;  %v412_v23 = vld [vmem:[%s1043_s2 + $0x170] sm:$0xff]  ;;  %v629_v8 = vadd.s32 4294967248, %v1101_v59  ;;  %v633_v12 = vadd.s32 4294967240, %v1101_v59 }
  0x9c   : > { %504 = vst [vmem:[#allocation2 + $0xa8] sm:$0xff] %v480_v47  ;;  %v479_v24 = vmax.f32 %v455_v22, %v431_v21  ;;  %v439_v25 = vsel %vm415_vm0, %v412_v23, -inf }
  0x9d   : > { %498 = vst [vmem:[#allocation2 + $0x18] sm:$0xff] %v474_v51  ;;  %v487_v27 = vmax.f32 %v463_v26, %v439_v25 }
  0x9e   : > { %500 = vst [vmem:[#allocation2 + $0x38] sm:$0xff] %v476_v55 }
  0x9f   : > { %506 = vst [vmem:[#allocation2 + $0x30] sm:$0xff] %v482_v60 }
  0xa0   : > { %499 = vst [vmem:[#allocation2 + $0x98] sm:$0xff] %v475_v63 }
  0xa1   : > { %508 = vst [vmem:[#allocation2 + $0x80] sm:$0xff] %v484_v2 }
  0xa2   : > { %554 = vmax.xlane.f32.xlu2 %v473_v31  ;;  %552 = vmax.xlane.f32.xlu1 %v472_v35  ;;  %501 = vst [vmem:[#allocation2 + $0x50] sm:$0xff] %v477_v7 }
  0xa3   : > { %548 = vmax.xlane.f32.xlu0 %v470_v39  ;;  %507 = vst [vmem:[#allocation2 + $0x58] sm:$0xff] %v483_v10 }
  0xa4   : > { %495 = vst [vmem:[#allocation2 + $0x78] sm:$0xff] %v471_v13 }
  0xa5   : > { %509 = vst [vmem:[#allocation2 + $0xb8] sm:$0xff] %v485_v14 }
  0xa6   : > { %502 = vst [vmem:[#allocation2 + $0x70] sm:$0xff] %v478_v17 }
  0xa7   : > { %510 = vst [vmem:[#allocation2 + $0x20] sm:$0xff] %v486_v19 }
  0xa8   : > { %503 = vst [vmem:[#allocation2 + $0xa0] sm:$0xff] %v479_v24 }
  0xa9   : > { %511 = vst [vmem:[#allocation2 + $0x8] sm:$0xff] %v487_v27 }
  0xaa   : > { %570 = vmax.xlane.f32.xlu2 %v1142_v43  ;;  %568 = vmax.xlane.f32.xlu1 %v480_v47  ;;  %v609_v43 = vadd.s32 4294967288, %v1101_v59 }
  0xab   : > { %556 = vmax.xlane.f32.xlu0 %v474_v51 }
  0xb2   : > { %560 = vmax.xlane.f32.xlu2 %v476_v55  ;;  %572 = vmax.xlane.f32.xlu1 %v482_v60  ;;  %v625_v55 = vadd.s32 4294967256, %v1101_v59 }
  0xb3   : > { %558 = vmax.xlane.f32.xlu0 %v475_v63 }
  0xba   : > { %576 = vmax.xlane.f32.xlu2 %v484_v2  ;;  %562 = vmax.xlane.f32.xlu1 %v477_v7 }
  0xbb   : > { %574 = vmax.xlane.f32.xlu0 %v483_v10 }
  0xc2   : > { %550 = vmax.xlane.f32.xlu2 %v471_v13  ;;  %578 = vmax.xlane.f32.xlu1 %v485_v14 }
  0xc3   : > { %564 = vmax.xlane.f32.xlu0 %v478_v17 }
  0xca   : > { %580 = vmax.xlane.f32.xlu1 %v486_v19  ;;  %582 = vmax.xlane.f32.xlu2 %v487_v27 }
  0xcb   : > { %566 = vmax.xlane.f32.xlu0 %v479_v24 }
 0x105   : > { %v545_v28 = vpop.xlane.xlu2 %544  ;;  %v541_v29 = vpop.xlane.xlu1 %540 }
 0x106   : > { %v537_v30 = vpop.xlane.xlu0 %536  ;;  %v614_v52 = vperm.slane %v541_v29, %v613_v45  ;;  %v622_v4 = vperm.slane %v545_v28, %v621_v53 }
 0x107   : > { %v608_v48 = vperm.slane %v537_v30, %v1101_v59 }
 0x10d   : > { %v547_v31 = vpop.xlane.xlu2 %546  ;;  %v543_v32 = vpop.xlane.xlu1 %542 }
 0x10e   : > { %v539_v33 = vpop.xlane.xlu0 %538  ;;  %v618_v56 = vperm.slane %v543_v32, %v617_v50  ;;  %v626_v7 = vperm.slane %v547_v31, %v625_v55 }
 0x10f   : > { %v610_v44 = vperm.slane %v539_v33, %v609_v43 }
 0x111   : > { %v612_v51 = vsel %vm611_vm1, %v610_v44, %v608_v48 }
 0x112   : > { %v616_v54 = vsel %vm615_vm2, %v614_v52, %v612_v51 }
 0x113   : > { %v620_v0 = vsel %vm619_vm3, %v618_v56, %v616_v54 }
 0x114   : > { %v624_v10 = vsel %vm623_vm4, %v622_v4, %v620_v0 }
 0x115   : > { %v555_v34 = vpop.xlane.xlu2 %554  ;;  %v553_v35 = vpop.xlane.xlu1 %552  ;;  %v628_v23 = vsel %vm627_vm5, %v626_v7, %v624_v10 }
 0x116   : > { %v1179_v36 = vpop.xlane.xlu0 %548  ;;  %v638_v57 = vperm.slane %v555_v34, %v609_v43  ;;  %v637_v58 = vperm.slane %v553_v35, %v1101_v59 }
 0x117   : > { %v630_v21 = vperm.slane %v1179_v36, %v629_v8 }
 0x118   : > { %v639_v9 = vsel %vm611_vm1, %v638_v57, %v637_v58 }
 0x119   : > { %v632_v34 = vsel %vm631_vm6, %v630_v21, %v628_v23 }
 0x11d   : > { %v571_v37 = vpop.xlane.xlu2 %570  ;;  %v569_v38 = vpop.xlane.xlu1 %568 }
 0x11e   : > { %v557_v39 = vpop.xlane.xlu0 %556  ;;  %v653_v60 = vperm.slane %v571_v37, %v609_v43  ;;  %v652_v61 = vperm.slane %v569_v38, %v1101_v59 }
 0x11f   : > { %v640_v1 = vperm.slane %v557_v39, %v613_v45 }
 0x120   : > { %v654_v11 = vsel %vm611_vm1, %v653_v60, %v652_v61 }
 0x121   : > { %v641_v13 = vsel %vm615_vm2, %v640_v1, %v639_v9 }
 0x125   : > { %v561_v40 = vpop.xlane.xlu2 %560  ;;  %v573_v41 = vpop.xlane.xlu1 %572 }
 0x126   : > { %v559_v42 = vpop.xlane.xlu0 %558  ;;  %v655_v2 = vperm.slane %v573_v41, %v613_v45  ;;  %v644_v14 = vperm.slane %v561_v40, %v621_v53 }
 0x127   : > { %v642_v5 = vperm.slane %v559_v42, %v617_v50 }
 0x128   : > { %v656_v15 = vsel %vm615_vm2, %v655_v2, %v654_v11 }
 0x129   : > { %v643_v17 = vsel %vm619_vm3, %v642_v5, %v641_v13 }
 0x12a   : > { %v645_v26 = vsel %vm623_vm4, %v644_v14, %v643_v17 }
 0x12d   : > { %v577_v46 = vpop.xlane.xlu2 %576  ;;  %v563_v47 = vpop.xlane.xlu1 %562 }
 0x12e   : > { %v575_v49 = vpop.xlane.xlu0 %574  ;;  %v659_v16 = vperm.slane %v577_v46, %v621_v53  ;;  %v646_v18 = vperm.slane %v563_v47, %v625_v55 }
 0x12f   : > { %v657_v6 = vperm.slane %v575_v49, %v617_v50 }
 0x130   : > { %v647_v31 = vsel %vm627_vm5, %v646_v18, %v645_v26 }
 0x131   : > { %v658_v19 = vsel %vm619_vm3, %v657_v6, %v656_v15 }
 0x132   : > { %v660_v27 = vsel %vm623_vm4, %v659_v16, %v658_v19 }
 0x135   : > { %v551_v62 = vpop.xlane.xlu2 %550  ;;  %v579_v63 = vpop.xlane.xlu1 %578 }
 0x136   : > { %v565_v3 = vpop.xlane.xlu0 %564  ;;  %v661_v20 = vperm.slane %v579_v63, %v625_v55  ;;  %v634_v59 = vperm.slane %v551_v62, %v633_v12 }
 0x137   : > { %v648_v22 = vperm.slane %v565_v3, %v629_v8 }
 0x138   : > { %v662_v32 = vsel %vm627_vm5, %v661_v20, %v660_v27  ;;  %v636_v37 = vsel %vm635_vm7, %v634_v59, %v632_v34 }
 0x139   : > { %v649_v35 = vsel %vm631_vm6, %v648_v22, %v647_v31 }
 0x13d   : > { %v581_v24 = vpop.xlane.xlu1 %580  ;;  %v583_v25 = vpop.xlane.xlu2 %582 }
 0x13e   : > { %v663_v28 = vperm.slane %v581_v24, %v629_v8  ;;  %v567_v29 = vpop.xlane.xlu0 %566  ;;  %v665_v30 = vperm.slane %v583_v25, %v633_v12 }
 0x13f   : > { %v650_v33 = vperm.slane %v567_v29, %v633_v12 }
 0x140   : > { %v664_v36 = vsel %vm631_vm6, %v663_v28, %v662_v32 }
 0x141   : > { %v651_v38 = vsel %vm635_vm7, %v650_v33, %v649_v35  ;;  %v666_v39 = vsel %vm635_vm7, %v665_v30, %v664_v36 }
 0x142   : > { %v668_v40 = vsel %vm667_vm8, %v651_v38, %v636_v37 }
 0x143   : > { %v670_v41 = vsel %vm669_vm9, %v666_v39, %v668_v40 }
 0x144   : > { %673 = vst.msk [vmem:[#allocation6] sm:$0x7] %vm672_vm10, %v670_v41 }
 0x145 PF: > { %p774_p9 = scmp.eq.s32.totalorder %s749_s12, 2  ;;  %s684_s21 = sshll.u32 %s1237_s1, 4  ;;  %s685_s21 = int_to_ptr.hbm [resolvable:$true] %s684_s21 }
 0x146   : > { %s955_s25 = smov [#allocation6]  }
 0x147   : > { %s682_s27 = sshll.u32 %s955_s25, 4  ;;  %s683_s27 = int_to_ptr.vmem [resolvable:$true] %s682_s27 }
 0x148   : > { %771 = dma.vmem_to_hbm [thread:$0]  (%p774_p9), %s683_s27, 64, %s685_s21, [#allocation5]  }
 0x149   : > { %924 = dma.done.wait (%p774_p9), [#allocation5], 64  }
 0x14a   : > { %926 = vsyncadd (%p774_p9), [#allocation5], 4294967232 }
 0x14b PF: > { %s15_s11 = sadd.s32 1, %s949_s11   ;;  %s1240_s6 = smov %s933_s7 }
 0x14c   : > { %p12_p10 = scmp.ge.s32.totalorder %s15_s11, 5   ;;  %s1241_s7 = smov %s937_s8 }
 0x14d   : > { %s1242_s8 = smov %s1012_s17  ;;  %s1243_s9 = smov %s945_s10 }
 0x14e   : > { %s1244_s10 = smov %s1246_s13  ;;  %14 = sbr.rel (!%p12_p10) target bundleno = 5 (0x5), region = 74 }
 0x153   :  { %698 = vsyncpa [#allocation4], 1 }
 0x154   :  { %700 = vsyncpa [#allocation4 + $0x1], 1 }
 0x155   :  { %701 = vsyncpa [#allocation5], 1 }
 0x156   :  { %703 = vsyncpa [#allocation5 + $0x1], 1 }

</bundles_post_ra>
